<compile_context>
chip_gen: v6e
topology: v6e:2x2x1
jax: 0.10.0
libtpu: 0.0.40
codegen_flags: <defaults>
</compile_context>

<pallas_src>
import functools

import jax
import jax.numpy as jnp
from jax import lax
from jax.experimental import pallas as pl
from jax.experimental.pallas import tpu as pltpu


# ----------------------------------------------------------------------------
# Fused kernel: image backbone + text backbone + MatchNet, batch-chunked grid.
# ----------------------------------------------------------------------------
def _fused_multimodal_kernel(img_ref, img_w_ref, img_b_ref,
                             txt_ref, txt_w_ref, txt_b_ref,
                             sim_ref,
                             img_feat_ref, txt_feat_ref,
                             s_img_ref, s_txt_ref,
                             *, chunk_rows):
    """Per grid step:
       img_ref: (tb, H*W, C)  txt_ref: (tb, S, Ht)  sim_ref: (B, Bt_pad)
       img_feat_ref: (B, F)   txt_feat_ref: (Bt_pad, F)   s_*_ref: (1, 1)
    """
    i = pl.program_id(0)

    @pl.when(i == 0)
    def _init():
        # Zero feature scratches (keeps the Bt padding rows exactly 0) and the
        # partial sum-of-squares accumulators.
        img_feat_ref[...] = jnp.zeros_like(img_feat_ref)
        txt_feat_ref[...] = jnp.zeros_like(txt_feat_ref)
        s_img_ref[...] = jnp.zeros_like(s_img_ref)
        s_txt_ref[...] = jnp.zeros_like(s_txt_ref)

    # ---- image backbone chunk: spatial sum-pool (sublane axis) + projection.
    # 1/(H*W) is folded into img_w by the wrapper, so sum == mean here.
    pooled_i = jnp.sum(img_ref[...], axis=1)                         # (tb, C)
    img_f = (
        jnp.dot(pooled_i, img_w_ref[...], preferred_element_type=jnp.float32)
        + img_b_ref[...]
    )                                                                # (tb, F)
    img_r = jnp.maximum(img_f, 0.0)

    # ---- text backbone chunk: sequence sum-pool + projection (1/S folded in).
    pooled_t = jnp.sum(txt_ref[...], axis=1)                         # (tb, Ht)
    txt_f = (
        jnp.dot(pooled_t, txt_w_ref[...], preferred_element_type=jnp.float32)
        + txt_b_ref[...]
    )                                                                # (tb, F)
    txt_r = jnp.maximum(txt_f, 0.0)

    # ---- stash ReLU'd features for the final matmul; accumulate ||.||^2.
    row0 = pl.multiple_of(i * chunk_rows, chunk_rows)
    img_feat_ref[pl.ds(row0, chunk_rows), :] = img_r
    txt_feat_ref[pl.ds(row0, chunk_rows), :] = txt_r

    s_img_ref[...] += jnp.sum(img_r * img_r, keepdims=True)          # (1, 1)
    s_txt_ref[...] += jnp.sum(txt_r * txt_r, keepdims=True)          # (1, 1)

    # ---- MatchNet finalize: (i/||i||) @ (t/||t||).T == (i @ t.T) * scale
    @pl.when(i == pl.num_programs(0) - 1)
    def _finalize():
        # Two EUP rsqrts (free slot) instead of rsqrt(s_img*s_txt): avoids f32
        # overflow/underflow of the product of two global sums of squares.
        scale = lax.rsqrt(s_img_ref[...]) * lax.rsqrt(s_txt_ref[...])  # (1, 1)
        sim = lax.dot_general(
            img_feat_ref[...], txt_feat_ref[...],
            dimension_numbers=(((1,), (1,)), ((), ())),
            preferred_element_type=jnp.float32,
        )                                                            # (B, Bt_pad)
        # Bt_pad is a multiple of 128 -> unmasked, lane-dense vst.
        sim_ref[...] = sim * scale


def _pick_chunk_rows(batch, per_row_bytes, budget_bytes):
    """Largest divisor of `batch` fitting the VMEM chunk budget, preferring at
    least 2 grid steps so the DMA pipeline can overlap with compute."""
    cap = max(1, budget_bytes // max(per_row_bytes, 1))
    if batch > 1:
        cap = min(cap, (batch + 1) // 2)
    cap = min(cap, batch)
    for tb in range(cap, 0, -1):
        if batch % tb == 0:
            return tb
    return 1


# ----------------------------------------------------------------------------
# Wrapper mirroring MultiModalClassifier.forward
# ----------------------------------------------------------------------------
def multimodal_classifier_forward(images, texts, params):
    """images: (B, C, H, W) float32 NCHW; texts: (B, S, H_txt) float32."""
    b, c, h, w = images.shape
    bt, s, ht = texts.shape
    f = params["img_w"].shape[1]
    hw = h * w
    itemsize = 4

    # NCHW -> (B, H*W, C): spatial pooling becomes a sublane reduction and C is
    # lane-dense for the projection matmul.  Done once in the wrapper.
    images_nhwc = images.transpose(0, 2, 3, 1).reshape(b, hw, c)

    # Fold the mean divisors into the projection weights (trace-time constant
    # folding) so the kernel can use jnp.sum.
    img_w = params["img_w"] * (1.0 / float(hw))
    txt_w = params["txt_w"] * (1.0 / float(s))
    img_b = params["img_b"]
    txt_b = params["txt_b"]

    # Lane-dense output: pad the similarity's last dim to a multiple of 128.
    bt_pad = ((bt + 127) // 128) * 128

    # ---- generation-aware VMEM budgeting ------------------------------------
    try:
        vmem_cap = int(pltpu.get_tpu_info().vmem_capacity_bytes)
    except Exception:  # conservative fallback (v7x per-TC capacity)
        vmem_cap = 64 << 20
    usable = (vmem_cap * 3) // 4        # ~48 MiB on v7x, ~96 MiB on v5e/v6e

    fixed_bytes = (
        (c * f + f + ht * f + f) * itemsize            # weights + biases
        + (b * f + bt_pad * f + 2) * itemsize          # feature / norm scratch
        + b * bt_pad * itemsize                        # resident output block
    )
    per_row_bytes = (hw * c + s * ht) * itemsize       # one batch row (img+txt)
    chunk_budget = max((usable - fixed_bytes) // 2 - (2 << 20), 1 << 20)
    tb = _pick_chunk_rows(b, per_row_bytes, chunk_budget)
    grid_steps = b // tb

    per_step_bytes = 2 * tb * per_row_bytes + fixed_bytes + (2 << 20)
    vmem_limit = int(min(usable, max(per_step_bytes, 16 << 20)))

    kernel = functools.partial(_fused_multimodal_kernel, chunk_rows=tb)

    grid_spec = pltpu.PrefetchScalarGridSpec(
        num_scalar_prefetch=0,
        grid=(grid_steps,),
        in_specs=[
            pl.BlockSpec((tb, hw, c), lambda i: (i, 0, 0)),   # images chunk
            pl.BlockSpec((c, f), lambda i: (0, 0)),           # img_w (resident)
            pl.BlockSpec((1, f), lambda i: (0, 0)),           # img_b
            pl.BlockSpec((tb, s, ht), lambda i: (i, 0, 0)),   # texts chunk
            pl.BlockSpec((ht, f), lambda i: (0, 0)),          # txt_w (resident)
            pl.BlockSpec((1, f), lambda i: (0, 0)),           # txt_b
        ],
        out_specs=pl.BlockSpec((b, bt_pad), lambda i: (0, 0)),  # resident acc
        scratch_shapes=[
            pltpu.VMEM((b, f), jnp.float32),        # ReLU'd image features
            pltpu.VMEM((bt_pad, f), jnp.float32),   # ReLU'd text features (pad=0)
            pltpu.VMEM((1, 1), jnp.float32),        # sum ||img||^2
            pltpu.VMEM((1, 1), jnp.float32),        # sum ||txt||^2
        ],
    )

    sim_padded = pl.pallas_call(
        kernel,
        out_shape=jax.ShapeDtypeStruct((b, bt_pad), jnp.float32),
        grid_spec=grid_spec,
        compiler_params=pltpu.CompilerParams(
            # The batch-chunk axis carries the norm accumulation + resident
            # output -> reduction semantics.
            dimension_semantics=("arbitrary",),
            vmem_limit_bytes=vmem_limit,
        ),
    )(images_nhwc, img_w, img_b, texts, txt_w, txt_b)

    return sim_padded[:, :bt]


# ----------------------------------------------------------------------------
# Pure-JAX reference for a sanity check (original, un-hoisted formulation)
# ----------------------------------------------------------------------------
def _reference(images, texts, params):
    b, c, h, w = images.shape
    pooled_i = images.reshape(b, c, h * w).mean(-1)
    img_feats = pooled_i @ params["img_w"] + params["img_b"]
    pooled_t = texts.mean(1)
    text_feats = pooled_t @ params["txt_w"] + params["txt_b"]
    i = jnp.maximum(img_feats, 0.0)
    t = jnp.maximum(text_feats, 0.0)
    i = i / jnp.linalg.norm(i)
    t = t / jnp.linalg.norm(t)
    return i @ t.T


if __name__ == "__main__":
    # Small shapes consistent with the forward:
    #   images: (B, C, H, W) = (2, 4, 16, 16)  [NCHW]
    #   texts : (B, S, H_txt) = (2, 8, 32)     [pre-embedded tokens]
    #   feat_dims = 32
    B, C, H, W = 2, 4, 16, 16
    S, H_TXT = 8, 32
    FEAT_DIMS = 32

    key = jax.random.PRNGKey(0)
    k_img, k_txt, k_wi, k_wt = jax.random.split(key, 4)

    images = jax.random.normal(k_img, (B, C, H, W), dtype=jnp.float32)
    texts = jax.random.normal(k_txt, (B, S, H_TXT), dtype=jnp.float32)

    params = {
        "img_w": 0.1 * jax.random.normal(k_wi, (C, FEAT_DIMS), dtype=jnp.float32),
        "img_b": jnp.zeros((1, FEAT_DIMS), dtype=jnp.float32),
        "txt_w": 0.1 * jax.random.normal(k_wt, (H_TXT, FEAT_DIMS), dtype=jnp.float32),
        "txt_b": jnp.zeros((1, FEAT_DIMS), dtype=jnp.float32),
    }

    sim = multimodal_classifier_forward(images, texts, params)
    sim = jax.block_until_ready(sim)

    ref = _reference(images, texts, params)
    assert sim.shape == (B, B), sim.shape
    assert jnp.allclose(sim, ref, atol=2e-5, rtol=1e-5), (sim, ref)

    print("KERNEL_OK")
</pallas_src>

<mosaic_0001>
module attributes {stable_mosaic.version = 11 : i64} {
  func.func @_fused_multimodal_kernel(%arg0: i32, %arg1: memref<1x256x4xf32, #tpu.memory_space<vmem>>, %arg2: memref<4x32xf32, #tpu.memory_space<vmem>>, %arg3: memref<1x32xf32, #tpu.memory_space<vmem>>, %arg4: memref<1x8x32xf32, #tpu.memory_space<vmem>>, %arg5: memref<32x32xf32, #tpu.memory_space<vmem>>, %arg6: memref<1x32xf32, #tpu.memory_space<vmem>>, %arg7: memref<2x128xf32, #tpu.memory_space<vmem>>, %arg8: memref<2x32xf32, #tpu.memory_space<vmem>>, %arg9: memref<128x32xf32, #tpu.memory_space<vmem>>, %arg10: memref<1x1xf32, #tpu.memory_space<vmem>>, %arg11: memref<1x1xf32, #tpu.memory_space<vmem>>) attributes {dimension_semantics = [#tpu.dimension_semantics<arbitrary>], iteration_bounds = array<i64: 2>, scalar_prefetch = 0 : i64, scratch_operands = 4 : i64, tpu.core_type = #tpu.core_type<tc>, window_params = [{transform_indices = @transform_0, window_bounds = array<i64: 1, 256, 4>}, {pipeline_mode = #tpu.pipeline_mode<synchronous>, transform_indices = @transform_1, window_bounds = array<i64: 4, 32>}, {pipeline_mode = #tpu.pipeline_mode<synchronous>, transform_indices = @transform_2, window_bounds = array<i64: 1, 32>}, {transform_indices = @transform_3, window_bounds = array<i64: 1, 8, 32>}, {pipeline_mode = #tpu.pipeline_mode<synchronous>, transform_indices = @transform_4, window_bounds = array<i64: 32, 32>}, {pipeline_mode = #tpu.pipeline_mode<synchronous>, transform_indices = @transform_5, window_bounds = array<i64: 1, 32>}, {pipeline_mode = #tpu.pipeline_mode<synchronous>, transform_indices = @transform_6, window_bounds = array<i64: 2, 128>}]} {
    %c0_i32 = arith.constant 0 : i32
    %0 = arith.cmpi eq, %arg0, %c0_i32 : i32
    %1 = arith.extui %0 : i1 to i32
    %c0_i32_0 = arith.constant 0 : i32
    %2 = arith.cmpi ne, %1, %c0_i32_0 : i32
    scf.if %2 {
      %cst_33 = arith.constant 0.000000e+00 : f32
      %46 = vector.broadcast %cst_33 : f32 to vector<2x32xf32>
      %c0_34 = arith.constant 0 : index
      %c0_35 = arith.constant 0 : index
      %47 = vector.load %arg8[%c0_34, %c0_35] : memref<2x32xf32, #tpu.memory_space<vmem>>, vector<2x32xf32>
      tpu.vector_store %arg8[%c0_34, %c0_35], %46 {strides = array<i32>} : memref<2x32xf32, #tpu.memory_space<vmem>>, vector<2x32xf32>,
      %cst_36 = arith.constant 0.000000e+00 : f32
      %48 = vector.broadcast %cst_36 : f32 to vector<128x32xf32>
      %c0_37 = arith.constant 0 : index
      %c0_38 = arith.constant 0 : index
      %49 = vector.load %arg9[%c0_37, %c0_38] : memref<128x32xf32, #tpu.memory_space<vmem>>, vector<128x32xf32>
      tpu.vector_store %arg9[%c0_37, %c0_38], %48 {strides = array<i32>} : memref<128x32xf32, #tpu.memory_space<vmem>>, vector<128x32xf32>,
      %cst_39 = arith.constant 0.000000e+00 : f32
      %50 = vector.broadcast %cst_39 : f32 to vector<1x1xf32>
      %c0_40 = arith.constant 0 : index
      %c0_41 = arith.constant 0 : index
      %51 = vector.load %arg10[%c0_40, %c0_41] : memref<1x1xf32, #tpu.memory_space<vmem>>, vector<1x1xf32>
      tpu.vector_store %arg10[%c0_40, %c0_41], %50 {strides = array<i32>} : memref<1x1xf32, #tpu.memory_space<vmem>>, vector<1x1xf32>,
      %cst_42 = arith.constant 0.000000e+00 : f32
      %52 = vector.broadcast %cst_42 : f32 to vector<1x1xf32>
      %c0_43 = arith.constant 0 : index
      %c0_44 = arith.constant 0 : index
      %53 = vector.load %arg11[%c0_43, %c0_44] : memref<1x1xf32, #tpu.memory_space<vmem>>, vector<1x1xf32>
      tpu.vector_store %arg11[%c0_43, %c0_44], %52 {strides = array<i32>} : memref<1x1xf32, #tpu.memory_space<vmem>>, vector<1x1xf32>,
    } else {
    }
    %c0 = arith.constant 0 : index
    %c0_1 = arith.constant 0 : index
    %c0_2 = arith.constant 0 : index
    %3 = vector.load %arg1[%c0, %c0_1, %c0_2] : memref<1x256x4xf32, #tpu.memory_space<vmem>>, vector<1x256x4xf32>
    %cst = arith.constant dense<0.000000e+00> : vector<1x4xf32>
    %4 = vector.multi_reduction <add>, %3, %cst [1] : vector<1x256x4xf32> to vector<1x4xf32>
    %c0_3 = arith.constant 0 : index
    %c0_4 = arith.constant 0 : index
    %5 = vector.load %arg2[%c0_3, %c0_4] : memref<4x32xf32, #tpu.memory_space<vmem>>, vector<4x32xf32>
    %cst_5 = arith.constant dense<0.000000e+00> : vector<1x32xf32>
    %6 = tpu.matmul %4, %5, %cst_5 {dimension_numbers = #tpu.dot_dimension_numbers<[1], [0], [0], [1], [0, 0, 1, 1], [], []>} : vector<1x4xf32>, vector<4x32xf32>, vector<1x32xf32> -> vector<1x32xf32>
    %c0_6 = arith.constant 0 : index
    %c0_7 = arith.constant 0 : index
    %7 = vector.load %arg3[%c0_6, %c0_7] : memref<1x32xf32, #tpu.memory_space<vmem>>, vector<1x32xf32>
    %8 = arith.addf %6, %7 : vector<1x32xf32>
    %cst_8 = arith.constant 0.000000e+00 : f32
    %9 = vector.broadcast %cst_8 : f32 to vector<1x32xf32>
    %10 = arith.maximumf %8, %9 : vector<1x32xf32>
    %c0_9 = arith.constant 0 : index
    %c0_10 = arith.constant 0 : index
    %c0_11 = arith.constant 0 : index
    %11 = vector.load %arg4[%c0_9, %c0_10, %c0_11] : memref<1x8x32xf32, #tpu.memory_space<vmem>>, vector<1x8x32xf32>
    %cst_12 = arith.constant dense<0.000000e+00> : vector<1x32xf32>
    %12 = vector.multi_reduction <add>, %11, %cst_12 [1] : vector<1x8x32xf32> to vector<1x32xf32>
    %c0_13 = arith.constant 0 : index
    %c0_14 = arith.constant 0 : index
    %13 = vector.load %arg5[%c0_13, %c0_14] : memref<32x32xf32, #tpu.memory_space<vmem>>, vector<32x32xf32>
    %cst_15 = arith.constant dense<0.000000e+00> : vector<1x32xf32>
    %14 = tpu.matmul %12, %13, %cst_15 {dimension_numbers = #tpu.dot_dimension_numbers<[1], [0], [0], [1], [0, 0, 1, 1], [], []>} : vector<1x32xf32>, vector<32x32xf32>, vector<1x32xf32> -> vector<1x32xf32>
    %c0_16 = arith.constant 0 : index
    %c0_17 = arith.constant 0 : index
    %15 = vector.load %arg6[%c0_16, %c0_17] : memref<1x32xf32, #tpu.memory_space<vmem>>, vector<1x32xf32>
    %16 = arith.addf %14, %15 : vector<1x32xf32>
    %cst_18 = arith.constant 0.000000e+00 : f32
    %17 = vector.broadcast %cst_18 : f32 to vector<1x32xf32>
    %18 = arith.maximumf %16, %17 : vector<1x32xf32>
    %c1_i32 = arith.constant 1 : i32
    %19 = arith.muli %arg0, %c1_i32 : i32
    %20 = tpu.assume_multiple %19, 1 : i32
    %21 = arith.index_cast %20 : i32 to index
    %c0_19 = arith.constant 0 : index
    %22 = vector.load %arg8[%21, %c0_19] : memref<2x32xf32, #tpu.memory_space<vmem>>, vector<1x32xf32>
    tpu.vector_store %arg8[%21, %c0_19], %10 {strides = array<i32>} : memref<2x32xf32, #tpu.memory_space<vmem>>, vector<1x32xf32>,
    %23 = arith.index_cast %20 : i32 to index
    %c0_20 = arith.constant 0 : index
    %24 = vector.load %arg9[%23, %c0_20] : memref<128x32xf32, #tpu.memory_space<vmem>>, vector<1x32xf32>
    tpu.vector_store %arg9[%23, %c0_20], %18 {strides = array<i32>} : memref<128x32xf32, #tpu.memory_space<vmem>>, vector<1x32xf32>,
    %c0_21 = arith.constant 0 : index
    %c0_22 = arith.constant 0 : index
    %25 = vector.load %arg10[%c0_21, %c0_22] : memref<1x1xf32, #tpu.memory_space<vmem>>, vector<1x1xf32>
    %26 = arith.mulf %10, %10 : vector<1x32xf32>
    %27 = vector.shape_cast %26 : vector<1x32xf32> to vector<1x1x32xf32>
    %cst_23 = arith.constant dense<0.000000e+00> : vector<1xf32>
    %28 = vector.multi_reduction <add>, %27, %cst_23 [1, 2] : vector<1x1x32xf32> to vector<1xf32>
    %29 = vector.shape_cast %28 : vector<1xf32> to vector<1x1x1xf32>
    %30 = vector.extract %29[0, 0, 0] : f32 from vector<1x1x1xf32>
    %31 = vector.broadcast %30 : f32 to vector<1x1xf32>
    %32 = arith.addf %25, %31 : vector<1x1xf32>
    %c0_24 = arith.constant 0 : index
    %c0_25 = arith.constant 0 : index
    %33 = vector.load %arg10[%c0_24, %c0_25] : memref<1x1xf32, #tpu.memory_space<vmem>>, vector<1x1xf32>
    tpu.vector_store %arg10[%c0_24, %c0_25], %32 {strides = array<i32>} : memref<1x1xf32, #tpu.memory_space<vmem>>, vector<1x1xf32>,
    %c0_26 = arith.constant 0 : index
    %c0_27 = arith.constant 0 : index
    %34 = vector.load %arg11[%c0_26, %c0_27] : memref<1x1xf32, #tpu.memory_space<vmem>>, vector<1x1xf32>
    %35 = arith.mulf %18, %18 : vector<1x32xf32>
    %36 = vector.shape_cast %35 : vector<1x32xf32> to vector<1x1x32xf32>
    %cst_28 = arith.constant dense<0.000000e+00> : vector<1xf32>
    %37 = vector.multi_reduction <add>, %36, %cst_28 [1, 2] : vector<1x1x32xf32> to vector<1xf32>
    %38 = vector.shape_cast %37 : vector<1xf32> to vector<1x1x1xf32>
    %39 = vector.extract %38[0, 0, 0] : f32 from vector<1x1x1xf32>
    %40 = vector.broadcast %39 : f32 to vector<1x1xf32>
    %41 = arith.addf %34, %40 : vector<1x1xf32>
    %c0_29 = arith.constant 0 : index
    %c0_30 = arith.constant 0 : index
    %42 = vector.load %arg11[%c0_29, %c0_30] : memref<1x1xf32, #tpu.memory_space<vmem>>, vector<1x1xf32>
    tpu.vector_store %arg11[%c0_29, %c0_30], %41 {strides = array<i32>} : memref<1x1xf32, #tpu.memory_space<vmem>>, vector<1x1xf32>,
    %c1_i32_31 = arith.constant 1 : i32
    %43 = arith.cmpi eq, %arg0, %c1_i32_31 : i32
    %44 = arith.extui %43 : i1 to i32
    %c0_i32_32 = arith.constant 0 : i32
    %45 = arith.cmpi ne, %44, %c0_i32_32 : i32
    scf.if %45 {
      %c0_33 = arith.constant 0 : index
      %c0_34 = arith.constant 0 : index
      %46 = vector.load %arg10[%c0_33, %c0_34] : memref<1x1xf32, #tpu.memory_space<vmem>>, vector<1x1xf32>
      %47 = math.rsqrt %46 : vector<1x1xf32>
      %c0_35 = arith.constant 0 : index
      %c0_36 = arith.constant 0 : index
      %48 = vector.load %arg11[%c0_35, %c0_36] : memref<1x1xf32, #tpu.memory_space<vmem>>, vector<1x1xf32>
      %49 = math.rsqrt %48 : vector<1x1xf32>
      %50 = arith.mulf %47, %49 : vector<1x1xf32>
      %c0_37 = arith.constant 0 : index
      %c0_38 = arith.constant 0 : index
      %51 = vector.load %arg8[%c0_37, %c0_38] : memref<2x32xf32, #tpu.memory_space<vmem>>, vector<2x32xf32>
      %c0_39 = arith.constant 0 : index
      %c0_40 = arith.constant 0 : index
      %52 = vector.load %arg9[%c0_39, %c0_40] : memref<128x32xf32, #tpu.memory_space<vmem>>, vector<128x32xf32>
      %cst_41 = arith.constant dense<0.000000e+00> : vector<2x128xf32>
      %53 = tpu.matmul %51, %52, %cst_41 {dimension_numbers = #tpu.dot_dimension_numbers<[1], [1], [0], [0], [0, 0, 1, 0], [], []>} : vector<2x32xf32>, vector<128x32xf32>, vector<2x128xf32> -> vector<2x128xf32>
      %54 = vector.broadcast %50 : vector<1x1xf32> to vector<2x128xf32>
      %55 = arith.mulf %53, %54 : vector<2x128xf32>
      %c0_42 = arith.constant 0 : index
      %c0_43 = arith.constant 0 : index
      %56 = vector.load %arg7[%c0_42, %c0_43] : memref<2x128xf32, #tpu.memory_space<vmem>>, vector<2x128xf32>
      tpu.vector_store %arg7[%c0_42, %c0_43], %55 {strides = array<i32>} : memref<2x128xf32, #tpu.memory_space<vmem>>, vector<2x128xf32>,
    } else {
    }
    return
  }
  func.func @transform_0(%arg0: i32) -> (i32, i32, i32) {
    %c0_i32 = arith.constant 0 : i32
    %c0_i32_0 = arith.constant 0 : i32
    %c0_i32_1 = arith.constant 0 : i32
    return %arg0, %c0_i32, %c0_i32_0 : i32, i32, i32
  }
  func.func @transform_1(%arg0: i32) -> (i32, i32) {
    %c0_i32 = arith.constant 0 : i32
    %c0_i32_0 = arith.constant 0 : i32
    %c0_i32_1 = arith.constant 0 : i32
    return %c0_i32, %c0_i32_0 : i32, i32
  }
  func.func @transform_2(%arg0: i32) -> (i32, i32) {
    %c0_i32 = arith.constant 0 : i32
    %c0_i32_0 = arith.constant 0 : i32
    %c0_i32_1 = arith.constant 0 : i32
    return %c0_i32, %c0_i32_0 : i32, i32
  }
  func.func @transform_3(%arg0: i32) -> (i32, i32, i32) {
    %c0_i32 = arith.constant 0 : i32
    %c0_i32_0 = arith.constant 0 : i32
    %c0_i32_1 = arith.constant 0 : i32
    return %arg0, %c0_i32, %c0_i32_0 : i32, i32, i32
  }
  func.func @transform_4(%arg0: i32) -> (i32, i32) {
    %c0_i32 = arith.constant 0 : i32
    %c0_i32_0 = arith.constant 0 : i32
    %c0_i32_1 = arith.constant 0 : i32
    return %c0_i32, %c0_i32_0 : i32, i32
  }
  func.func @transform_5(%arg0: i32) -> (i32, i32) {
    %c0_i32 = arith.constant 0 : i32
    %c0_i32_0 = arith.constant 0 : i32
    %c0_i32_1 = arith.constant 0 : i32
    return %c0_i32, %c0_i32_0 : i32, i32
  }
  func.func @transform_6(%arg0: i32) -> (i32, i32) {
    %c0_i32 = arith.constant 0 : i32
    %c0_i32_0 = arith.constant 0 : i32
    %c0_i32_1 = arith.constant 0 : i32
    return %c0_i32, %c0_i32_0 : i32, i32
  }
}

</mosaic_0001>

<bundles_post_ra>
// kernel: tpu_custom_call.1
= control target key start
LH: loop header
LB: loop body
LE: loop exit
PB: predicated region body
PF: predicated region fallthrough
CT: control target
= control target key end

     0   :  { %11 = vsyncpa [#allocation7], 0  ;;  %s1030_s21 = smov 0   ;;  %s1195_s0 = inlined_call_operand.vmem [shape: f32[2,256,4], index: 0, kind: input, shape index: {}]   ;;  %s1196_s1 = inlined_call_operand.vmem [shape: f32[4,32], index: 1, kind: input, shape index: {}]   ;;  %s1197_s2 = inlined_call_operand.vmem [shape: f32[1,32], index: 2, kind: input, shape index: {}]   ;;  %s1198_s3 = inlined_call_operand.vmem [shape: f32[2,8,32], index: 3, kind: input, shape index: {}]   ;;  %s1199_s4 = inlined_call_operand.vmem [shape: f32[32,32], index: 4, kind: input, shape index: {}]   ;;  %s1200_s5 = inlined_call_operand.vmem [shape: f32[1,32], index: 5, kind: input, shape index: {}]   ;;  %s1201_s6 = inlined_call_operand.hbm [shape: f32[2,128], index: 6, kind: output, shape index: {}]  }
   0x1 LB: > { %s1036_s22 = sadd.s32 4294967295, %s986_s21   ;;  %p808_p0 = scmp.ge.s32.totalorder %s986_s21, 1  ;;  %s986_s21 = sphi %s1030_s21, %s17_s21  }
   0x2   : > { %p217_p1 = scmp.lt.s32.totalorder %s986_s21, 3 }
   0x4   : > { %p218_p2 = pnand %p808_p0, %p217_p1 }
   0x5   : > { %p246_p3 = scmp.lt.s32.totalorder (!%p218_p2), %s1036_s22, 1  ;;  %p812_p4 = scmp.ne.s32.totalorder (!%p218_p2), %s1036_s22, 0 }
   0x6   : > { %221 = sbr.rel (%p218_p2) target bundleno = 789 (0x315), region = 44 }
   0xb   : > { %s247_s23 = scalar_select %p246_p3, %s1036_s22, 1 }
   0xc   : > { %258 = sbr.rel (%p812_p4) target bundleno = 28 (0x1c), region = 48 }
   0xd   : > { %s840_s24 = sshll.u32 %s247_s23, 8  ;;  %s811_s25 = sshll.u32 %s247_s23, 3 }
   0xe   : > { %s1045_s28 = scalar_lea.vmem %s1195_s0, %s840_s24  ;;  %s1050_s7 = scalar_lea.vmem %s1198_s3, %s811_s25 }
  0x11   : > { %vm259_vm0 = vcmask 254976   ;;  %vm261_vm1 = vcmask 261120   ;;  %vm278_vm2 = vcmask 0   ;;  %v988_v0 = vmov 0.0  }
  0x12   : > { %260 = vst.msk [vmem:[#allocation2] sm:$0x3] %vm259_vm0, %v988_v0 }
  0x13   : > { %262 = vst.msk [vmem:[#allocation3] sm:$0xff] %vm261_vm1, %v988_v0  ;;  %263 = vst.msk [vmem:[#allocation3 + $0x8] sm:$0xff] %vm261_vm1, %v988_v0 }
  0x14   : > { %264 = vst.msk [vmem:[#allocation3 + $0x10] sm:$0xff] %vm261_vm1, %v988_v0  ;;  %265 = vst.msk [vmem:[#allocation3 + $0x18] sm:$0xff] %vm261_vm1, %v988_v0 }
  0x15   : > { %266 = vst.msk [vmem:[#allocation3 + $0x20] sm:$0xff] %vm261_vm1, %v988_v0  ;;  %267 = vst.msk [vmem:[#allocation3 + $0x28] sm:$0xff] %vm261_vm1, %v988_v0 }
  0x16   : > { %268 = vst.msk [vmem:[#allocation3 + $0x30] sm:$0xff] %vm261_vm1, %v988_v0  ;;  %269 = vst.msk [vmem:[#allocation3 + $0x38] sm:$0xff] %vm261_vm1, %v988_v0 }
  0x17   : > { %270 = vst.msk [vmem:[#allocation3 + $0x40] sm:$0xff] %vm261_vm1, %v988_v0  ;;  %271 = vst.msk [vmem:[#allocation3 + $0x48] sm:$0xff] %vm261_vm1, %v988_v0 }
  0x18   : > { %272 = vst.msk [vmem:[#allocation3 + $0x50] sm:$0xff] %vm261_vm1, %v988_v0  ;;  %273 = vst.msk [vmem:[#allocation3 + $0x58] sm:$0xff] %vm261_vm1, %v988_v0 }
  0x19   : > { %274 = vst.msk [vmem:[#allocation3 + $0x60] sm:$0xff] %vm261_vm1, %v988_v0  ;;  %275 = vst.msk [vmem:[#allocation3 + $0x68] sm:$0xff] %vm261_vm1, %v988_v0 }
  0x1a   : > { %276 = vst.msk [vmem:[#allocation3 + $0x70] sm:$0xff] %vm261_vm1, %v988_v0  ;;  %277 = vst.msk [vmem:[#allocation3 + $0x78] sm:$0xff] %vm261_vm1, %v988_v0 }
  0x1b   : > { %279 = vst.msk [vmem:[#allocation4] sm:$0x1] %vm278_vm2, %v988_v0  ;;  %280 = vst.msk [vmem:[#allocation5] sm:$0x1] %vm278_vm2, %v988_v0 }
  0x1c PF: > { %v475_v1 = vld [vmem:[%s1199_s4 + $0x18] sm:$0xff]  ;;  %v383_v2 = vld [vmem:[%s1196_s1] sm:$0xf]  ;;  %vm388_vm3 = vcmask 1043456   ;;  %v989_v3 = vmov 0.0   ;;  %v474_v4 = vld [vmem:[%s1199_s4 + $0x10] sm:$0xff] }
  0x1d   : > { %876 = vmatprep.subr.mxu1 %v989_v3  ;;  %871 = vmatprep.subr.mxu0 %v989_v3  ;;  %v281_v5 = vld [vmem:[%s1045_s28] sm:$0xff]  ;;  %v282_v6 = vld [vmem:[%s1045_s28 + $0x8] sm:$0xff]  ;;  %vm313_vm4 = vcmask 31744   ;;  %v283_v7 = vld [vmem:[%s1045_s28 + $0x10] sm:$0xff]  ;;  %vm990_vm5 = vmmov 0   ;;  %vm464_vm6 = vcmask 261120  }
  0x1e   : > { %877 = vmatpush3.msra.mxu1 %v475_v1  ;;  %872 = vmatpush3.msk.msra.mxu0 %vm388_vm3, %v383_v2  ;;  %v284_v8 = vld [vmem:[%s1045_s28 + $0x18] sm:$0xff]  ;;  %v314_v9 = vsel %vm313_vm4, %v281_v5, 0.0  ;;  %v315_v10 = vsel %vm313_vm4, %v282_v6, 0.0  ;;  %v473_v11 = vld [vmem:[%s1199_s4 + $0x8] sm:$0xff]  ;;  %v285_v12 = vld [vmem:[%s1045_s28 + $0x20] sm:$0xff]  ;;  %v317_v14 = vsel %vm313_vm4, %v283_v7, 0.0 }
  0x1f   : > { %878 = vmatprep.subr.mxu1 %v989_v3  ;;  %873 = vmatprep.mubr.msk.f32.mxu0 %vm990_vm5, %v989_v3  ;;  %v316_v13 = vadd.f32 %v315_v10, %v314_v9  ;;  %v319_v15 = vsel %vm313_vm4, %v284_v8, 0.0  ;;  %v286_v16 = vld [vmem:[%s1045_s28 + $0x28] sm:$0xff]  ;;  %v321_v18 = vsel %vm313_vm4, %v285_v12, 0.0  ;;  %v287_v19 = vld [vmem:[%s1045_s28 + $0x30] sm:$0xff]  ;;  %v288_v22 = vld [vmem:[%s1045_s28 + $0x38] sm:$0xff]  ;;  %vm552_vm7 = vcmask 253952  }
  0x20   : > { %879 = vmatpush3.msra.mxu1 %v474_v4  ;;  %884 = vmatprep.mubr.msk.f32.mxu1 %vm990_vm5, %v989_v3  ;;  %v323_v21 = vsel %vm313_vm4, %v286_v16, 0.0  ;;  %v325_v24 = vsel %vm313_vm4, %v287_v19, 0.0  ;;  %v289_v25 = vld [vmem:[%s1045_s28 + $0x40] sm:$0xff]  ;;  %v327_v27 = vsel %vm313_vm4, %v288_v22, 0.0  ;;  %v290_v30 = vld [vmem:[%s1045_s28 + $0x48] sm:$0xff]  ;;  %v291_v35 = vld [vmem:[%s1045_s28 + $0x50] sm:$0xff] }
  0x21   : > { %880 = vmatprep.subr.mxu1 %v989_v3  ;;  %v318_v17 = vadd.f32 %v317_v14, %v316_v13  ;;  %v472_v28 = vld [vmem:[%s1199_s4] sm:$0xff]  ;;  %v329_v33 = vsel %vm313_vm4, %v289_v25, 0.0  ;;  %v331_v37 = vsel %vm313_vm4, %v290_v30, 0.0  ;;  %v292_v39 = vld [vmem:[%s1045_s28 + $0x58] sm:$0xff]  ;;  %v333_v41 = vsel %vm313_vm4, %v291_v35, 0.0  ;;  %v294_v47 = vld [vmem:[%s1045_s28 + $0x68] sm:$0xff] }
  0x22   : > { %881 = vmatpush3.msra.mxu1 %v473_v11  ;;  %v463_v29 = vld [vmem:[%s1050_s7] sm:$0xff]  ;;  %v335_v45 = vsel %vm313_vm4, %v292_v39, 0.0  ;;  %v295_v51 = vld [vmem:[%s1045_s28 + $0x70] sm:$0xff]  ;;  %v339_v53 = vsel %vm313_vm4, %v294_v47, 0.0  ;;  %v296_v55 = vld [vmem:[%s1045_s28 + $0x78] sm:$0xff]  ;;  %s844_s20 = scalar_lea.vmem [#allocation3], %s986_s21 }
  0x23   : > { %v320_v20 = vadd.f32 %v319_v15, %v318_v17  ;;  %882 = vmatprep.subr.mxu1 %v989_v3  ;;  %v465_v32 = vsel %vm464_vm6, %v463_v29, 0.0  ;;  %v293_v43 = vld [vmem:[%s1045_s28 + $0x60] sm:$0xff]  ;;  %v341_v57 = vsel %vm313_vm4, %v295_v51, 0.0  ;;  %v343_v60 = vsel %vm313_vm4, %v296_v55, 0.0  ;;  %v298_v61 = vld [vmem:[%s1045_s28 + $0x88] sm:$0xff]  ;;  %v299_v0 = vld [vmem:[%s1045_s28 + $0x90] sm:$0xff] }
  0x24   : > { %883 = vmatpush3.msra.mxu1 %v472_v28  ;;  %v466_v34 = vrot.slane %v465_v32, 4  ;;  %v337_v49 = vsel %vm313_vm4, %v293_v43, 0.0  ;;  %v297_v58 = vld [vmem:[%s1045_s28 + $0x80] sm:$0xff]  ;;  %v347_v2 = vsel %vm313_vm4, %v298_v61, 0.0  ;;  %v300_v3 = vld [vmem:[%s1045_s28 + $0x98] sm:$0xff]  ;;  %v349_v5 = vsel %vm313_vm4, %v299_v0, 0.0 }
  0x25   : > { %v322_v23 = vadd.f32 %v321_v18, %v320_v20  ;;  %v345_v63 = vsel %vm313_vm4, %v297_v58, 0.0  ;;  %v301_v6 = vld [vmem:[%s1045_s28 + $0xa0] sm:$0xff]  ;;  %v351_v8 = vsel %vm313_vm4, %v300_v3, 0.0  ;;  %v302_v9 = vld [vmem:[%s1045_s28 + $0xa8] sm:$0xff]  ;;  %v303_v12 = vld [vmem:[%s1045_s28 + $0xb0] sm:$0xff]  ;;  %s841_s25 = scalar_lea.vmem [#allocation2], %s986_s21 }
  0x26   : > { %v467_v38 = vadd.f32 %v466_v34, %v465_v32  ;;  %v353_v11 = vsel %vm313_vm4, %v301_v6, 0.0  ;;  %v355_v14 = vsel %vm313_vm4, %v302_v9, 0.0  ;;  %v304_v15 = vld [vmem:[%s1045_s28 + $0xb8] sm:$0xff]  ;;  %v357_v17 = vsel %vm313_vm4, %v303_v12, 0.0  ;;  %v305_v18 = vld [vmem:[%s1045_s28 + $0xc0] sm:$0xff]  ;;  %p818_p5 = scmp.ne.s32.totalorder %s1036_s22, 1 }
  0x27   : > { %v324_v26 = vadd.f32 %v323_v21, %v322_v23  ;;  %v359_v20 = vsel %vm313_vm4, %v304_v15, 0.0  ;;  %v306_v21 = vld [vmem:[%s1045_s28 + $0xc8] sm:$0xff]  ;;  %v361_v23 = vsel %vm313_vm4, %v305_v18, 0.0  ;;  %v309_v30 = vld [vmem:[%s1045_s28 + $0xe0] sm:$0xff]  ;;  %v312_v39 = vld [vmem:[%s1045_s28 + $0xf8] sm:$0xff]  ;;  %vm570_vm8 = vcmask 0  }
  0x28   : > { %v468_v42 = vrot.slane %v467_v38, 2  ;;  %v369_v35 = vsel %vm313_vm4, %v309_v30, 0.0  ;;  %v375_v43 = vsel %vm313_vm4, %v312_v39, 0.0 }
  0x29   : > { %v326_v31 = vadd.f32 %v325_v24, %v324_v26  ;;  %v307_v24 = vld [vmem:[%s1045_s28 + $0xd0] sm:$0xff]  ;;  %v363_v26 = vsel %vm313_vm4, %v306_v21, 0.0 }
  0x2a   : > { %v469_v46 = vadd.f32 %v468_v42, %v467_v38  ;;  %v365_v29 = vsel %vm313_vm4, %v307_v24, 0.0 }
  0x2b   : > { %v328_v36 = vadd.f32 %v327_v27, %v326_v31  ;;  %v308_v27 = vld [vmem:[%s1045_s28 + $0xd8] sm:$0xff] }
  0x2c   : > { %v470_v50 = vrot.slane %v469_v46, 1  ;;  %v367_v32 = vsel %vm313_vm4, %v308_v27, 0.0 }
  0x2d   : > { %v330_v40 = vadd.f32 %v329_v33, %v328_v36  ;;  %v310_v33 = vld [vmem:[%s1045_s28 + $0xe8] sm:$0xff]  ;;  %v311_v36 = vld [vmem:[%s1045_s28 + $0xf0] sm:$0xff] }
  0x2e   : > { %v471_v54 = vadd.f32 %v470_v50, %v469_v46  ;;  %v371_v38 = vsel %vm313_vm4, %v310_v33, 0.0 }
  0x2f   : > { %v332_v44 = vadd.f32 %v331_v37, %v330_v40 }
  0x30   : > { %885 = vmatmul.mubr.msk.f32.vlgmr.msra.gmra.mxu1 %vm464_vm6, %v471_v54 }
  0x31   : > { %v334_v48 = vadd.f32 %v333_v41, %v332_v44  ;;  %v373_v41 = vsel %vm313_vm4, %v311_v36, 0.0 }
  0x33   : > { %v336_v52 = vadd.f32 %v335_v45, %v334_v48 }
  0x35   : > { %v338_v56 = vadd.f32 %v337_v49, %v336_v52  ;;  %v476_v52 = vld [vmem:[%s1200_s5] sm:$0x1] }
  0x37   : > { %v340_v59 = vadd.f32 %v339_v53, %v338_v56 }
  0x39   : > { %v342_v62 = vadd.f32 %v341_v57, %v340_v59  ;;  %v384_v57 = vld [vmem:[%s1197_s2] sm:$0x1] }
  0x3b   : > { %v344_v1 = vadd.f32 %v343_v60, %v342_v62 }
  0x3d   : > { %v346_v4 = vadd.f32 %v345_v63, %v344_v1 }
  0x3f   : > { %v348_v7 = vadd.f32 %v347_v2, %v346_v4 }
  0x41   : > { %v350_v10 = vadd.f32 %v349_v5, %v348_v7 }
  0x43   : > { %v352_v13 = vadd.f32 %v351_v8, %v350_v10 }
  0x45   : > { %v354_v16 = vadd.f32 %v353_v11, %v352_v13 }
  0x47   : > { %v356_v19 = vadd.f32 %v355_v14, %v354_v16  ;;  %v556_v16 = vld [vmem:[#allocation4] sm:$0x1] }
  0x49   : > { %v358_v22 = vadd.f32 %v357_v17, %v356_v19  ;;  %v572_v19 = vld [vmem:[#allocation5] sm:$0x1] }
  0x4b   : > { %v360_v25 = vadd.f32 %v359_v20, %v358_v22 }
  0x4d   : > { %v362_v28 = vadd.f32 %v361_v23, %v360_v25 }
  0x4f   : > { %v364_v31 = vadd.f32 %v363_v26, %v362_v28 }
  0x51   : > { %v366_v34 = vadd.f32 %v365_v29, %v364_v31 }
  0x53   : > { %v368_v37 = vadd.f32 %v367_v32, %v366_v34 }
  0x55   : > { %v370_v40 = vadd.f32 %v369_v35, %v368_v37 }
  0x57   : > { %v372_v42 = vadd.f32 %v371_v38, %v370_v40 }
  0x59   : > { %v374_v44 = vadd.f32 %v373_v41, %v372_v42 }
  0x5b   : > { %v376_v45 = vadd.f32 %v375_v43, %v374_v44 }
  0x5d   : > { %v377_v46 = vrot.slane %v376_v45, 4 }
  0x5f   : > { %v378_v47 = vadd.f32 %v377_v46, %v376_v45 }
  0x61   : > { %v379_v48 = vrot.slane %v378_v47, 2 }
  0x63   : > { %v380_v49 = vadd.f32 %v379_v48, %v378_v47 }
  0x65   : > { %v381_v50 = vrot.slane %v380_v49, 1 }
  0x67   : > { %v382_v51 = vadd.f32 %v381_v50, %v380_v49 }
  0x69   : > { %874 = vmatmul.mubr.msk.f32.vlgmr.msra.gmra.mxu0 %vm313_vm4, %v382_v51 }
  0xf0   : > { %v546_v53 = vpop.f32.mrf.mxu1 }
  0xf1   : > { %v547_v54 = vadd.f32 %v546_v53, %v476_v52 }
  0xf2   : > { %v886_v55 = vpop.f32.mrf.mxu1 }
  0xf3   : > { %v550_v56 = vmax.f32 %v547_v54, 0.0 }
  0xf5   : > { %846 = vst.msk [vmem:[%s844_s20 - $0x1] sm:$0x1] %vm552_vm7, %v550_v56  ;;  %v573_v63 = vmul.f32 %v550_v56, %v550_v56 }
  0xf7   : > { %v574_v1 = vsel %vm552_vm7, %v573_v63, 0.0 }
 0x129   : > { %v458_v58 = vpop.f32.mrf.mxu0 }
 0x12a   : > { %v459_v59 = vadd.f32 %v458_v58, %v384_v57 }
 0x12b   : > { %v875_v60 = vpop.f32.mrf.mxu0 }
 0x12c   : > { %v462_v61 = vmax.f32 %v459_v59, 0.0 }
 0x12e   : > { %v557_v62 = vmul.f32 %v462_v61, %v462_v61  ;;  %843 = vst.msk [vmem:[%s841_s25 - $0x1] sm:$0x1] %vm552_vm7, %v462_v61 }
 0x130   : > { %v558_v0 = vsel %vm552_vm7, %v557_v62, 0.0 }
 0x131   : > { %559 = vadd.xlane.f32.xlu0 %v558_v0 }
 0x135   : > { %575 = vadd.xlane.f32.xlu0 %v574_v1 }
 0x1ba   : > { %v560_v2 = vpop.xlane.xlu0 %559 }
 0x1bb   : > { %v561_v3 = vrot.slane %v560_v2, 4 }
 0x1bd   : > { %v562_v4 = vadd.f32 %v561_v3, %v560_v2 }
 0x1be   : > { %v576_v5 = vpop.xlane.xlu0 %575 }
 0x1bf   : > { %v563_v6 = vrot.slane %v562_v4, 2  ;;  %v577_v7 = vrot.slane %v576_v5, 4 }
 0x1c1   : > { %v578_v8 = vadd.f32 %v577_v7, %v576_v5  ;;  %v564_v9 = vadd.f32 %v563_v6, %v562_v4 }
 0x1c3   : > { %v579_v10 = vrot.slane %v578_v8, 2  ;;  %v565_v11 = vrot.slane %v564_v9, 1 }
 0x1c5   : > { %v580_v12 = vadd.f32 %v579_v10, %v578_v8  ;;  %v566_v13 = vadd.f32 %v565_v11, %v564_v9 }
 0x1c7   : > { %922 = vpush %v566_v13  ;;  %v581_v14 = vrot.slane %v580_v12, 1 }
 0x1c9   : > { %v582_v15 = vadd.f32 %v581_v14, %v580_v12 }
 0x1cb   : > { %924 = vpush %v582_v15 }
 0x1f8   : > { %s923_s26 = spop %922 }
 0x1f9   : > { %v568_v17 = vstv %s923_s26 }
 0x1fa   : > { %v569_v18 = vadd.f32 %v568_v17, %v556_v16 }
 0x1fc   : > { %571 = vst.msk [vmem:[#allocation4] sm:$0x1] %vm570_vm8, %v569_v18  ;;  %s925_s27 = spop %924  ;;  %590 = sbr.rel (%p818_p5) target bundleno = 774 (0x306), region = 52 }
 0x1fd   : > { %v584_v20 = vstv %s925_s27 }
 0x1fe   : > { %v585_v21 = vadd.f32 %v584_v20, %v572_v19 }
 0x200   : > { %586 = vst.msk [vmem:[#allocation5] sm:$0x1] %vm570_vm8, %v585_v21 }
 0x201   : > { %v612_v22 = vld [vmem:[#allocation3 + $0x78] sm:$0xff]  ;;  %v991_v23 = vmov 0.0   ;;  %vm992_vm9 = vmmov 0   ;;  %v993_v24 = vmov 0   ;;  %v611_v25 = vld [vmem:[#allocation3 + $0x70] sm:$0xff]  ;;  %v610_v28 = vld [vmem:[#allocation3 + $0x68] sm:$0xff]  ;;  %v735_v30 = vlaneseq }
 0x202   : > { %887 = vmatprep.subr.mxu0 %v991_v23  ;;  %919 = vmatprep.mubr.msk.f32.mxu0 %vm992_vm9, %v991_v23  ;;  %v609_v29 = vld [vmem:[#allocation3 + $0x60] sm:$0xff]  ;;  %v608_v31 = vld [vmem:[#allocation3 + $0x58] sm:$0xff]  ;;  %v607_v34 = vld [vmem:[#allocation3 + $0x50] sm:$0xff] }
 0x203   : > { %888 = vmatpush3.xpose.msk.msra.mxu0 %vm464_vm6, %v612_v22  ;;  %947 = vset.pattern.permute.xlu0 %v993_v24  ;;  %v591_v26 = vld [vmem:[#allocation4] sm:$0x1]  ;;  %v736_v32 = vshrl.u32 %v735_v30, 7  ;;  %v606_v38 = vld [vmem:[#allocation3 + $0x48] sm:$0xff]  ;;  %v604_v41 = vld [vmem:[#allocation3 + $0x38] sm:$0xff] }
 0x204   : > { %889 = vmatprep.subr.mxu0 %v991_v23  ;;  %948 = vrsqrt.f32 %v591_v26  ;;  %v605_v40 = vld [vmem:[#allocation3 + $0x40] sm:$0xff]  ;;  %v603_v42 = vld [vmem:[#allocation3 + $0x30] sm:$0xff]  ;;  %v602_v43 = vld [vmem:[#allocation3 + $0x28] sm:$0xff] }
 0x205   : > { %v737_v35 = vsub.s32 0, %v736_v32  ;;  %v601_v44 = vld [vmem:[#allocation3 + $0x20] sm:$0xff]  ;;  %v600_v45 = vld [vmem:[#allocation3 + $0x18] sm:$0xff]  ;;  %v599_v46 = vld [vmem:[#allocation3 + $0x10] sm:$0xff] }
 0x206   : > { %v598_v47 = vld [vmem:[#allocation3 + $0x8] sm:$0xff]  ;;  %v597_v48 = vld [vmem:[#allocation3] sm:$0xff]  ;;  %v596_v49 = vld [vmem:[#allocation2] sm:$0x3] }
 0x207   : > { %890 = vmatpush3.xpose.msk.msra.mxu0 %vm464_vm6, %v611_v25  ;;  %v593_v27 = vld [vmem:[#allocation5] sm:$0x1] }
 0x208   : > { %891 = vmatprep.subr.mxu0 %v991_v23  ;;  %950 = vrsqrt.f32 %v593_v27 }
 0x20b   : > { %892 = vmatpush3.xpose.msk.msra.mxu0 %vm464_vm6, %v610_v28 }
 0x20c   : > { %893 = vmatprep.subr.mxu0 %v991_v23 }
 0x20f   : > { %894 = vmatpush3.xpose.msk.msra.mxu0 %vm464_vm6, %v609_v29 }
 0x210   : > { %895 = vmatprep.subr.mxu0 %v991_v23 }
 0x211   : > { %v949_v33 = vpop.eup %948 }
 0x213   : > { %896 = vmatpush3.xpose.msk.msra.mxu0 %vm464_vm6, %v608_v31 }
 0x214   : > { %897 = vmatprep.subr.mxu0 %v991_v23 }
 0x215   : > { %v951_v36 = vpop.eup %950 }
 0x216   : > { %v595_v37 = vmul.f32 %v951_v36, %v949_v33 }
 0x217   : > { %898 = vmatpush3.xpose.msk.msra.mxu0 %vm464_vm6, %v607_v34 }
 0x218   : > { %899 = vmatprep.subr.mxu0 %v991_v23  ;;  %v738_v39 = vrot.slane %v595_v37, %v737_v35 }
 0x21a   : > { %740 = vperm.xlu0 %947, %v738_v39  }
 0x21b   : > { %900 = vmatpush3.xpose.msk.msra.mxu0 %vm464_vm6, %v606_v38 }
 0x21c   : > { %901 = vmatprep.subr.mxu0 %v991_v23 }
 0x21f   : > { %902 = vmatpush3.xpose.msk.msra.mxu0 %vm464_vm6, %v605_v40 }
 0x220   : > { %903 = vmatprep.subr.mxu0 %v991_v23 }
 0x223   : > { %904 = vmatpush3.xpose.msk.msra.mxu0 %vm464_vm6, %v604_v41 }
 0x224   : > { %905 = vmatprep.subr.mxu0 %v991_v23 }
 0x227   : > { %906 = vmatpush3.xpose.msk.msra.mxu0 %vm464_vm6, %v603_v42 }
 0x228   : > { %907 = vmatprep.subr.mxu0 %v991_v23 }
 0x22b   : > { %908 = vmatpush3.xpose.msk.msra.mxu0 %vm464_vm6, %v602_v43 }
 0x22c   : > { %909 = vmatprep.subr.mxu0 %v991_v23 }
 0x22f   : > { %910 = vmatpush3.xpose.msk.msra.mxu0 %vm464_vm6, %v601_v44 }
 0x230   : > { %911 = vmatprep.subr.mxu0 %v991_v23 }
 0x233   : > { %912 = vmatpush3.xpose.msk.msra.mxu0 %vm464_vm6, %v600_v45 }
 0x234   : > { %913 = vmatprep.subr.mxu0 %v991_v23 }
 0x237   : > { %914 = vmatpush3.xpose.msk.msra.mxu0 %vm464_vm6, %v599_v46 }
 0x238   : > { %915 = vmatprep.subr.mxu0 %v991_v23 }
 0x23b   : > { %916 = vmatpush3.xpose.msk.msra.mxu0 %vm464_vm6, %v598_v47 }
 0x23c   : > { %917 = vmatprep.subr.mxu0 %v991_v23 }
 0x23f   : > { %918 = vmatpush3.xpose.msk.msra.mxu0 %vm464_vm6, %v597_v48 }
 0x242   : > { %920 = vmatmul.mubr.msk.f32.vlgmr.msra.gmra.mxu0 %vm464_vm6, %v596_v49 }
 0x295   : > { %v741_v50 = vpop.permute.xlu0 %740 }
 0x302   : > { %v730_v51 = vpop.f32.mrf.mxu0 }
 0x303   : > { %v743_v52 = vmul.f32 %v741_v50, %v730_v51 }
 0x304   : > { %v921_v53 = vpop.f32.mrf.mxu0 }
 0x305   : > { %744 = vst [vmem:[#allocation6] sm:$0x3] %v743_v52 }
 0x306 PF: > { %p930_p6 = scmp.eq.s32.totalorder %s1036_s22, 1  ;;  %s994_s28 = smov [#allocation6]  }
 0x307   : > { %s752_s29 = sshll.u32 %s994_s28, 4  ;;  %s753_s29 = int_to_ptr.vmem [resolvable:$true] %s752_s29 }
 0x308   : > { %s952_s30 = scalar_lea.vmem %s753_s29, 32  ;;  %p959_p10 = scmp.lt.s32.totalorder %s753_s29, %s753_s29 }
 0x309   : > { %p953_p7 = scmp.ne.s32.totalorder %s753_s29, %s952_s30  ;;  %p960_p11 = scmp.lt.s32.totalorder %s952_s30, %s952_s30 }
 0x30b   : > { %p954_p8 = pnand %p953_p7, %p930_p6  ;;  %p961_p12 = por %p960_p11, %p959_p10 }
 0x30d   : > { %p955_p9 = pneg %p954_p8 }
 0x30f   : > { %p962_p13 = pnand %p961_p12, %p955_p9 }
 0x311   : > { %965 = shalt.err (!%p962_p13)
}
 0x312   : > { %927 = dma.vmem_to_hbm [thread:$0]  (%p930_p6), %s753_s29, 32, %s1201_s6, [#allocation7]  }
 0x313   : > { %981 = dma.done.wait (%p930_p6), [#allocation7], 32  }
 0x314   : > { %983 = vsyncadd (%p930_p6), [#allocation7], 4294967264 }
 0x315 PF: > { %s17_s21 = sadd.s32 1, %s986_s21  }
 0x316   : > { %p14_p0 = scmp.ge.s32.totalorder %s17_s21, 4  }
 0x318   :  { %16 = sbr.rel (!%p14_p0) target bundleno = 1 (0x1), region = 84 }
 0x31d   :  { %765 = vsyncpa [#allocation7], 1 }
 0x31e   :  { %767 = vsyncpa [#allocation7 + $0x1], 1 }

</bundles_post_ra>
